<compile_context>
chip_gen: v6e
topology: v6e:2x2x1
jax: 0.10.0
libtpu: 0.0.40
codegen_flags: <defaults>
</compile_context>

<pallas_src>
import numpy as np
import jax
import jax.numpy as jnp
from jax import lax
from jax.experimental import pallas as pl
from jax.experimental.pallas import tpu as pltpu


def clip_loss_kernel(scale_ref, img_ref, aud_ref, flow_ref, out_ref):
    sqrt_scale = scale_ref[0]                 # exp(0.5 * logit_scale), from SMEM
    scale = sqrt_scale * sqrt_scale           # exp(logit_scale), for the LSE gate

    # MXU operand dtype: keep bf16 inputs in bf16 (f32 accumulation on the MXU);
    # all elementwise / softmax math stays f32 (v5e has no bf16 VPU/EUP).
    mm_dtype = jnp.bfloat16 if img_ref.dtype == jnp.bfloat16 else jnp.float32

    def norm_scale(x_ref):
        # L2-normalize along the hidden (lane) axis with sqrt(scale) folded in.
        x = x_ref[...].astype(jnp.float32)
        inv = lax.rsqrt(jnp.sum(x * x, axis=-1, keepdims=True))
        return x * (inv * sqrt_scale)

    img = norm_scale(img_ref)                 # (B, D) f32, carries sqrt(scale)
    aud = norm_scale(aud_ref)
    flow = norm_scale(flow_ref)

    # Cast MXU operands once, right after normalization.
    img_m = img.astype(mm_dtype)
    aud_m = aud.astype(mm_dtype)
    flow_m = flow.astype(mm_dtype)

    b = img.shape[0]

    # Correct-class diagonal logits straight from the features (no eye mask,
    # no masked reduction): diag[i] = scale * <f1_i, f2_i>.
    mean_diag_ia = jnp.mean(jnp.sum(img * aud, axis=-1, keepdims=True),
                            axis=0, keepdims=True)                      # (1, 1)
    mean_diag_if = jnp.mean(jnp.sum(img * flow, axis=-1, keepdims=True),
                            axis=0, keepdims=True)
    mean_diag_fa = jnp.mean(jnp.sum(flow * aud, axis=-1, keepdims=True),
                            axis=0, keepdims=True)

    # Logits on the MXU (scale already folded into both operands).
    # Exact-block formulation: [img; flow] @ aud.T gives both "vs audio"
    # matrices via sublane-aligned row slices; img @ flow.T gives the third.
    dnums = (((1,), (1,)), ((), ()))
    if b % 8 == 0:
        imgflow = jnp.concatenate([img_m, flow_m], axis=0)              # (2B, D)
        g = lax.dot_general(imgflow, aud_m, dnums,
                            preferred_element_type=jnp.float32)         # (2B, B)
        logits_ia = g[0:b, :]                                           # img  @ aud.T
        logits_fa = g[b:2 * b, :]                                       # flow @ aud.T
    else:
        logits_ia = lax.dot_general(img_m, aud_m, dnums,
                                    preferred_element_type=jnp.float32)
        logits_fa = lax.dot_general(flow_m, aud_m, dnums,
                                    preferred_element_type=jnp.float32)
    logits_if = lax.dot_general(img_m, flow_m, dnums,
                                preferred_element_type=jnp.float32)     # img @ flow.T

    # Row maxes are needed by both softmax paths (cheap XLU reductions).
    mr_ia = jnp.max(logits_ia, axis=-1, keepdims=True)                  # (B, 1)
    mr_if = jnp.max(logits_if, axis=-1, keepdims=True)
    mr_fa = jnp.max(logits_fa, axis=-1, keepdims=True)

    def lse_half_fast(logits, m_r):
        # Shared global max, single exp pass. Valid when 2*scale < ~87: logits
        # are bounded by +-scale, so no row/column underflows to exact zero.
        m = jnp.max(m_r, axis=0, keepdims=True)                         # (1, 1)
        e = jnp.exp(logits - m)                                         # (B, B)
        mlr = jnp.mean(m + jnp.log(jnp.sum(e, axis=-1, keepdims=True)),
                       axis=0, keepdims=True)                           # (1, 1)
        mlc = jnp.mean(m + jnp.log(jnp.sum(e, axis=0, keepdims=True)),
                       axis=1, keepdims=True)                           # (1, 1)
        return 0.5 * (mlr + mlc)

    def lse_half_safe(logits, m_r):
        # Per-row / per-column maxes, two exp passes; robust for any scale.
        m_c = jnp.max(logits, axis=0, keepdims=True)                    # (1, B)
        e_r = jnp.exp(logits - m_r)
        e_c = jnp.exp(logits - m_c)
        mlr = jnp.mean(m_r + jnp.log(jnp.sum(e_r, axis=-1, keepdims=True)),
                       axis=0, keepdims=True)
        mlc = jnp.mean(m_c + jnp.log(jnp.sum(e_c, axis=0, keepdims=True)),
                       axis=1, keepdims=True)
        return 0.5 * (mlr + mlc)

    def finalize(h_ia, h_if, h_fa):
        # pair loss = mean(row_lse - diag)/2 + mean(col_lse - diag)/2
        l_ia = h_ia - mean_diag_ia
        l_if = h_if - mean_diag_if
        l_fa = h_fa - mean_diag_fa
        total = (l_ia + l_if + l_fa) * (1.0 / 3.0)
        # One packed store: [total, loss_img_aud, loss_img_flow, loss_flow_aud].
        out_ref[...] = jnp.concatenate([total, l_ia, l_if, l_fa], axis=1)

    # Gate the robustness fix on the runtime scale so the common case keeps
    # exactly one exp pass per pair (EUP is the critical slot for small D).
    @pl.when(scale < 40.0)
    def _():
        finalize(lse_half_fast(logits_ia, mr_ia),
                 lse_half_fast(logits_if, mr_if),
                 lse_half_fast(logits_fa, mr_fa))

    @pl.when(scale >= 40.0)
    def _():
        finalize(lse_half_safe(logits_ia, mr_ia),
                 lse_half_safe(logits_if, mr_if),
                 lse_half_safe(logits_fa, mr_fa))


def clip_loss_1d(image_features, audio_features, flow_features, logit_scale_param):
    """Pallas implementation of CLIPLoss1D.forward.

    Returns (mean_loss, [loss_img_aud, loss_img_flow, loss_flow_aud]).
    """
    b, d = image_features.shape

    # The kernel only needs sqrt(exp(logit_scale)) = exp(0.5 * logit_scale);
    # fold the 0.5 here instead of a scalar sqrt in the kernel.
    sqrt_scale = jnp.exp(0.5 * logit_scale_param).reshape((1,)).astype(jnp.float32)

    # Explicit VMEM budget sized from the real footprint: input buffers +
    # normalized f32 features + MXU-operand copies + the (2B,B) and (B,B)
    # logits + one exp buffer, with 2x headroom for compiler temporaries.
    def rup(x, m):
        return ((x + m - 1) // m) * m

    in_bytes = jnp.dtype(image_features.dtype).itemsize
    mm_bytes = 2 if image_features.dtype == jnp.bfloat16 else 4
    bp_s = rup(max(b, 8), 8)           # sublane-padded batch
    bp_l = rup(max(b, 128), 128)       # lane-padded batch (logits last dim)
    dp = rup(max(d, 128), 128)         # lane-padded hidden
    feat_bytes = 3 * bp_s * dp * (in_bytes + 4 + mm_bytes)
    logit_bytes = 4 * bp_s * bp_l * 4
    vmem_limit = int(min(max(2 * (feat_bytes + logit_bytes) + (1 << 20), 32 << 20),
                         64 << 20))

    out = pl.pallas_call(
        clip_loss_kernel,
        out_shape=jax.ShapeDtypeStruct((1, 4), jnp.float32),
        in_specs=[
            pl.BlockSpec(memory_space=pltpu.MemorySpace.SMEM),   # sqrt(scale) scalar
            pl.BlockSpec(memory_space=pltpu.MemorySpace.VMEM),   # image features
            pl.BlockSpec(memory_space=pltpu.MemorySpace.VMEM),   # audio features
            pl.BlockSpec(memory_space=pltpu.MemorySpace.VMEM),   # flow features
        ],
        out_specs=pl.BlockSpec(memory_space=pltpu.MemorySpace.VMEM),
        compiler_params=pltpu.CompilerParams(vmem_limit_bytes=vmem_limit),
    )(sqrt_scale, image_features, audio_features, flow_features)

    total = out[0, 0]
    return total, [out[0, 1], out[0, 2], out[0, 3]]


def _ref_clip_loss(img, aud, flow, log_scale):
    """Pure-JAX reference mirroring the PyTorch module exactly."""
    def norm(x):
        return x / jnp.linalg.norm(x, axis=-1, keepdims=True)

    img, aud, flow = norm(img), norm(aud), norm(flow)
    scale = jnp.exp(log_scale)
    b = img.shape[0]
    idx = jnp.arange(b)

    def ce(logits):  # CrossEntropyLoss with labels = arange(b), mean reduction
        return jnp.mean(jax.nn.logsumexp(logits, axis=-1) - logits[idx, idx])

    def pair(f1, f2):
        l1 = scale * f1 @ f2.T
        return (ce(l1) + ce(l1.T)) / 2.0

    l_ia = pair(img, aud)
    l_if = pair(img, flow)
    l_fa = pair(flow, aud)
    return (l_ia + l_if + l_fa) / 3.0, [l_ia, l_if, l_fa]


if __name__ == "__main__":
    B, D = 8, 32  # batch, hidden
    key = jax.random.PRNGKey(0)
    k_img, k_aud, k_flow = jax.random.split(key, 3)
    image_features = jax.random.normal(k_img, (B, D), dtype=jnp.float32)
    audio_features = jax.random.normal(k_aud, (B, D), dtype=jnp.float32)
    flow_features = jax.random.normal(k_flow, (B, D), dtype=jnp.float32)

    # Deterministic parameter init, same as the module: logit_scale = log(1/0.07).
    logit_scale = jnp.asarray(np.log(1.0 / 0.07), dtype=jnp.float32)

    total, pair_losses = clip_loss_1d(
        image_features, audio_features, flow_features, logit_scale
    )
    total = jax.block_until_ready(total)
    pair_losses = [jax.block_until_ready(x) for x in pair_losses]

    ref_total, ref_pairs = _ref_clip_loss(
        image_features, audio_features, flow_features, logit_scale
    )
    np.testing.assert_allclose(np.asarray(total), np.asarray(ref_total),
                               rtol=1e-5, atol=1e-5)
    for got, want in zip(pair_losses, ref_pairs):
        np.testing.assert_allclose(np.asarray(got), np.asarray(want),
                                   rtol=1e-5, atol=1e-5)

    # Also exercise the robust (per-axis-max) softmax path at large logit_scale.
    big_scale = jnp.asarray(np.log(100.0), dtype=jnp.float32)   # exp = 100 >= 40
    total2, pairs2 = clip_loss_1d(
        image_features, audio_features, flow_features, big_scale
    )
    total2 = jax.block_until_ready(total2)
    ref_total2, ref_pairs2 = _ref_clip_loss(
        image_features, audio_features, flow_features, big_scale
    )
    np.testing.assert_allclose(np.asarray(total2), np.asarray(ref_total2),
                               rtol=1e-5, atol=1e-4)
    for got, want in zip(pairs2, ref_pairs2):
        np.testing.assert_allclose(np.asarray(jax.block_until_ready(got)),
                                   np.asarray(want), rtol=1e-5, atol=1e-4)

    print("KERNEL_OK")
</pallas_src>

<mosaic_0001>
module attributes {stable_mosaic.version = 11 : i64} {
  func.func @clip_loss_kernel(%arg0: memref<1xf32, #tpu.memory_space<smem>>, %arg1: memref<8x32xf32, #tpu.memory_space<vmem>>, %arg2: memref<8x32xf32, #tpu.memory_space<vmem>>, %arg3: memref<8x32xf32, #tpu.memory_space<vmem>>, %arg4: memref<1x4xf32, #tpu.memory_space<vmem>>) attributes {dimension_semantics = [], scalar_prefetch = 0 : i64, scratch_operands = 0 : i64, tpu.core_type = #tpu.core_type<tc>} {
    %c0 = arith.constant 0 : index
    %0 = memref.load %arg0[%c0] : memref<1xf32, #tpu.memory_space<smem>>
    %1 = arith.mulf %0, %0 : f32
    %c0_0 = arith.constant 0 : index
    %c0_1 = arith.constant 0 : index
    %2 = vector.load %arg1[%c0_0, %c0_1] : memref<8x32xf32, #tpu.memory_space<vmem>>, vector<8x32xf32>
    %3 = arith.mulf %2, %2 : vector<8x32xf32>
    %cst = arith.constant dense<0.000000e+00> : vector<8xf32>
    %4 = vector.multi_reduction <add>, %3, %cst [1] : vector<8x32xf32> to vector<8xf32>
    %5 = vector.shape_cast %4 : vector<8xf32> to vector<8x1xf32>
    %6 = math.rsqrt %5 : vector<8x1xf32>
    %7 = vector.broadcast %0 : f32 to vector<8x1xf32>
    %8 = arith.mulf %6, %7 : vector<8x1xf32>
    %9 = vector.broadcast %8 : vector<8x1xf32> to vector<8x32xf32>
    %10 = arith.mulf %2, %9 : vector<8x32xf32>
    %c0_2 = arith.constant 0 : index
    %c0_3 = arith.constant 0 : index
    %11 = vector.load %arg2[%c0_2, %c0_3] : memref<8x32xf32, #tpu.memory_space<vmem>>, vector<8x32xf32>
    %12 = arith.mulf %11, %11 : vector<8x32xf32>
    %cst_4 = arith.constant dense<0.000000e+00> : vector<8xf32>
    %13 = vector.multi_reduction <add>, %12, %cst_4 [1] : vector<8x32xf32> to vector<8xf32>
    %14 = vector.shape_cast %13 : vector<8xf32> to vector<8x1xf32>
    %15 = math.rsqrt %14 : vector<8x1xf32>
    %16 = vector.broadcast %0 : f32 to vector<8x1xf32>
    %17 = arith.mulf %15, %16 : vector<8x1xf32>
    %18 = vector.broadcast %17 : vector<8x1xf32> to vector<8x32xf32>
    %19 = arith.mulf %11, %18 : vector<8x32xf32>
    %c0_5 = arith.constant 0 : index
    %c0_6 = arith.constant 0 : index
    %20 = vector.load %arg3[%c0_5, %c0_6] : memref<8x32xf32, #tpu.memory_space<vmem>>, vector<8x32xf32>
    %21 = arith.mulf %20, %20 : vector<8x32xf32>
    %cst_7 = arith.constant dense<0.000000e+00> : vector<8xf32>
    %22 = vector.multi_reduction <add>, %21, %cst_7 [1] : vector<8x32xf32> to vector<8xf32>
    %23 = vector.shape_cast %22 : vector<8xf32> to vector<8x1xf32>
    %24 = math.rsqrt %23 : vector<8x1xf32>
    %25 = vector.broadcast %0 : f32 to vector<8x1xf32>
    %26 = arith.mulf %24, %25 : vector<8x1xf32>
    %27 = vector.broadcast %26 : vector<8x1xf32> to vector<8x32xf32>
    %28 = arith.mulf %20, %27 : vector<8x32xf32>
    %29 = arith.mulf %10, %19 : vector<8x32xf32>
    %cst_8 = arith.constant dense<0.000000e+00> : vector<8xf32>
    %30 = vector.multi_reduction <add>, %29, %cst_8 [1] : vector<8x32xf32> to vector<8xf32>
    %31 = vector.shape_cast %30 : vector<8xf32> to vector<8x1xf32>
    %cst_9 = arith.constant dense<0.000000e+00> : vector<1xf32>
    %32 = vector.multi_reduction <add>, %31, %cst_9 [0] : vector<8x1xf32> to vector<1xf32>
    %33 = vector.shape_cast %32 : vector<1xf32> to vector<1x1xf32>
    %cst_10 = arith.constant 8.000000e+00 : f32
    %34 = vector.broadcast %cst_10 : f32 to vector<1x1xf32>
    %35 = arith.divf %33, %34 : vector<1x1xf32>
    %36 = arith.mulf %10, %28 : vector<8x32xf32>
    %cst_11 = arith.constant dense<0.000000e+00> : vector<8xf32>
    %37 = vector.multi_reduction <add>, %36, %cst_11 [1] : vector<8x32xf32> to vector<8xf32>
    %38 = vector.shape_cast %37 : vector<8xf32> to vector<8x1xf32>
    %cst_12 = arith.constant dense<0.000000e+00> : vector<1xf32>
    %39 = vector.multi_reduction <add>, %38, %cst_12 [0] : vector<8x1xf32> to vector<1xf32>
    %40 = vector.shape_cast %39 : vector<1xf32> to vector<1x1xf32>
    %cst_13 = arith.constant 8.000000e+00 : f32
    %41 = vector.broadcast %cst_13 : f32 to vector<1x1xf32>
    %42 = arith.divf %40, %41 : vector<1x1xf32>
    %43 = arith.mulf %28, %19 : vector<8x32xf32>
    %cst_14 = arith.constant dense<0.000000e+00> : vector<8xf32>
    %44 = vector.multi_reduction <add>, %43, %cst_14 [1] : vector<8x32xf32> to vector<8xf32>
    %45 = vector.shape_cast %44 : vector<8xf32> to vector<8x1xf32>
    %cst_15 = arith.constant dense<0.000000e+00> : vector<1xf32>
    %46 = vector.multi_reduction <add>, %45, %cst_15 [0] : vector<8x1xf32> to vector<1xf32>
    %47 = vector.shape_cast %46 : vector<1xf32> to vector<1x1xf32>
    %cst_16 = arith.constant 8.000000e+00 : f32
    %48 = vector.broadcast %cst_16 : f32 to vector<1x1xf32>
    %49 = arith.divf %47, %48 : vector<1x1xf32>
    %50 = tpu.concatenate %10, %28 in 0 : vector<8x32xf32>, vector<8x32xf32> -> vector<16x32xf32>
    %cst_17 = arith.constant dense<0.000000e+00> : vector<16x8xf32>
    %51 = tpu.matmul %50, %19, %cst_17 {dimension_numbers = #tpu.dot_dimension_numbers<[1], [1], [0], [0], [0, 0, 1, 0], [], []>} : vector<16x32xf32>, vector<8x32xf32>, vector<16x8xf32> -> vector<16x8xf32>
    %52 = vector.extract_strided_slice %51 {offsets = [0, 0], sizes = [8, 8], strides = [1, 1]} : vector<16x8xf32> to vector<8x8xf32>
    %53 = vector.extract_strided_slice %51 {offsets = [8, 0], sizes = [8, 8], strides = [1, 1]} : vector<16x8xf32> to vector<8x8xf32>
    %cst_18 = arith.constant dense<0.000000e+00> : vector<8x8xf32>
    %54 = tpu.matmul %10, %28, %cst_18 {dimension_numbers = #tpu.dot_dimension_numbers<[1], [1], [0], [0], [0, 0, 1, 0], [], []>} : vector<8x32xf32>, vector<8x32xf32>, vector<8x8xf32> -> vector<8x8xf32>
    %cst_19 = arith.constant dense<0xFF800000> : vector<8xf32>
    %55 = vector.multi_reduction <maximumf>, %52, %cst_19 [1] : vector<8x8xf32> to vector<8xf32>
    %56 = vector.shape_cast %55 : vector<8xf32> to vector<8x1xf32>
    %cst_20 = arith.constant dense<0xFF800000> : vector<8xf32>
    %57 = vector.multi_reduction <maximumf>, %54, %cst_20 [1] : vector<8x8xf32> to vector<8xf32>
    %58 = vector.shape_cast %57 : vector<8xf32> to vector<8x1xf32>
    %cst_21 = arith.constant dense<0xFF800000> : vector<8xf32>
    %59 = vector.multi_reduction <maximumf>, %53, %cst_21 [1] : vector<8x8xf32> to vector<8xf32>
    %60 = vector.shape_cast %59 : vector<8xf32> to vector<8x1xf32>
    %cst_22 = arith.constant 4.000000e+01 : f32
    %61 = arith.cmpf olt, %1, %cst_22 : f32
    %62 = arith.extui %61 : i1 to i32
    %c0_i32 = arith.constant 0 : i32
    %63 = arith.cmpi ne, %62, %c0_i32 : i32
    scf.if %63 {
      %cst_25 = arith.constant dense<0xFF800000> : vector<1xf32>
      %67 = vector.multi_reduction <maximumf>, %56, %cst_25 [0] : vector<8x1xf32> to vector<1xf32>
      %68 = vector.shape_cast %67 : vector<1xf32> to vector<1x1xf32>
      %69 = vector.broadcast %68 : vector<1x1xf32> to vector<8x8xf32>
      %70 = arith.subf %52, %69 : vector<8x8xf32>
      %71 = math.exp %70 : vector<8x8xf32>
      %cst_26 = arith.constant dense<0.000000e+00> : vector<8xf32>
      %72 = vector.multi_reduction <add>, %71, %cst_26 [1] : vector<8x8xf32> to vector<8xf32>
      %73 = vector.shape_cast %72 : vector<8xf32> to vector<8x1xf32>
      %74 = math.log %73 : vector<8x1xf32>
      %75 = vector.broadcast %68 : vector<1x1xf32> to vector<8x1xf32>
      %76 = arith.addf %75, %74 : vector<8x1xf32>
      %cst_27 = arith.constant dense<0.000000e+00> : vector<1xf32>
      %77 = vector.multi_reduction <add>, %76, %cst_27 [0] : vector<8x1xf32> to vector<1xf32>
      %78 = vector.shape_cast %77 : vector<1xf32> to vector<1x1xf32>
      %cst_28 = arith.constant 8.000000e+00 : f32
      %79 = vector.broadcast %cst_28 : f32 to vector<1x1xf32>
      %80 = arith.divf %78, %79 : vector<1x1xf32>
      %cst_29 = arith.constant dense<0.000000e+00> : vector<8xf32>
      %81 = vector.multi_reduction <add>, %71, %cst_29 [0] : vector<8x8xf32> to vector<8xf32>
      %82 = vector.shape_cast %81 : vector<8xf32> to vector<1x8xf32>
      %83 = math.log %82 : vector<1x8xf32>
      %84 = vector.broadcast %68 : vector<1x1xf32> to vector<1x8xf32>
      %85 = arith.addf %84, %83 : vector<1x8xf32>
      %cst_30 = arith.constant dense<0.000000e+00> : vector<1xf32>
      %86 = vector.multi_reduction <add>, %85, %cst_30 [1] : vector<1x8xf32> to vector<1xf32>
      %87 = vector.shape_cast %86 : vector<1xf32> to vector<1x1xf32>
      %cst_31 = arith.constant 8.000000e+00 : f32
      %88 = vector.broadcast %cst_31 : f32 to vector<1x1xf32>
      %89 = arith.divf %87, %88 : vector<1x1xf32>
      %90 = arith.addf %80, %89 : vector<1x1xf32>
      %cst_32 = arith.constant 5.000000e-01 : f32
      %91 = vector.broadcast %cst_32 : f32 to vector<1x1xf32>
      %92 = arith.mulf %91, %90 : vector<1x1xf32>
      %cst_33 = arith.constant dense<0xFF800000> : vector<1xf32>
      %93 = vector.multi_reduction <maximumf>, %58, %cst_33 [0] : vector<8x1xf32> to vector<1xf32>
      %94 = vector.shape_cast %93 : vector<1xf32> to vector<1x1xf32>
      %95 = vector.broadcast %94 : vector<1x1xf32> to vector<8x8xf32>
      %96 = arith.subf %54, %95 : vector<8x8xf32>
      %97 = math.exp %96 : vector<8x8xf32>
      %cst_34 = arith.constant dense<0.000000e+00> : vector<8xf32>
      %98 = vector.multi_reduction <add>, %97, %cst_34 [1] : vector<8x8xf32> to vector<8xf32>
      %99 = vector.shape_cast %98 : vector<8xf32> to vector<8x1xf32>
      %100 = math.log %99 : vector<8x1xf32>
      %101 = vector.broadcast %94 : vector<1x1xf32> to vector<8x1xf32>
      %102 = arith.addf %101, %100 : vector<8x1xf32>
      %cst_35 = arith.constant dense<0.000000e+00> : vector<1xf32>
      %103 = vector.multi_reduction <add>, %102, %cst_35 [0] : vector<8x1xf32> to vector<1xf32>
      %104 = vector.shape_cast %103 : vector<1xf32> to vector<1x1xf32>
      %cst_36 = arith.constant 8.000000e+00 : f32
      %105 = vector.broadcast %cst_36 : f32 to vector<1x1xf32>
      %106 = arith.divf %104, %105 : vector<1x1xf32>
      %cst_37 = arith.constant dense<0.000000e+00> : vector<8xf32>
      %107 = vector.multi_reduction <add>, %97, %cst_37 [0] : vector<8x8xf32> to vector<8xf32>
      %108 = vector.shape_cast %107 : vector<8xf32> to vector<1x8xf32>
      %109 = math.log %108 : vector<1x8xf32>
      %110 = vector.broadcast %94 : vector<1x1xf32> to vector<1x8xf32>
      %111 = arith.addf %110, %109 : vector<1x8xf32>
      %cst_38 = arith.constant dense<0.000000e+00> : vector<1xf32>
      %112 = vector.multi_reduction <add>, %111, %cst_38 [1] : vector<1x8xf32> to vector<1xf32>
      %113 = vector.shape_cast %112 : vector<1xf32> to vector<1x1xf32>
      %cst_39 = arith.constant 8.000000e+00 : f32
      %114 = vector.broadcast %cst_39 : f32 to vector<1x1xf32>
      %115 = arith.divf %113, %114 : vector<1x1xf32>
      %116 = arith.addf %106, %115 : vector<1x1xf32>
      %cst_40 = arith.constant 5.000000e-01 : f32
      %117 = vector.broadcast %cst_40 : f32 to vector<1x1xf32>
      %118 = arith.mulf %117, %116 : vector<1x1xf32>
      %cst_41 = arith.constant dense<0xFF800000> : vector<1xf32>
      %119 = vector.multi_reduction <maximumf>, %60, %cst_41 [0] : vector<8x1xf32> to vector<1xf32>
      %120 = vector.shape_cast %119 : vector<1xf32> to vector<1x1xf32>
      %121 = vector.broadcast %120 : vector<1x1xf32> to vector<8x8xf32>
      %122 = arith.subf %53, %121 : vector<8x8xf32>
      %123 = math.exp %122 : vector<8x8xf32>
      %cst_42 = arith.constant dense<0.000000e+00> : vector<8xf32>
      %124 = vector.multi_reduction <add>, %123, %cst_42 [1] : vector<8x8xf32> to vector<8xf32>
      %125 = vector.shape_cast %124 : vector<8xf32> to vector<8x1xf32>
      %126 = math.log %125 : vector<8x1xf32>
      %127 = vector.broadcast %120 : vector<1x1xf32> to vector<8x1xf32>
      %128 = arith.addf %127, %126 : vector<8x1xf32>
      %cst_43 = arith.constant dense<0.000000e+00> : vector<1xf32>
      %129 = vector.multi_reduction <add>, %128, %cst_43 [0] : vector<8x1xf32> to vector<1xf32>
      %130 = vector.shape_cast %129 : vector<1xf32> to vector<1x1xf32>
      %cst_44 = arith.constant 8.000000e+00 : f32
      %131 = vector.broadcast %cst_44 : f32 to vector<1x1xf32>
      %132 = arith.divf %130, %131 : vector<1x1xf32>
      %cst_45 = arith.constant dense<0.000000e+00> : vector<8xf32>
      %133 = vector.multi_reduction <add>, %123, %cst_45 [0] : vector<8x8xf32> to vector<8xf32>
      %134 = vector.shape_cast %133 : vector<8xf32> to vector<1x8xf32>
      %135 = math.log %134 : vector<1x8xf32>
      %136 = vector.broadcast %120 : vector<1x1xf32> to vector<1x8xf32>
      %137 = arith.addf %136, %135 : vector<1x8xf32>
      %cst_46 = arith.constant dense<0.000000e+00> : vector<1xf32>
      %138 = vector.multi_reduction <add>, %137, %cst_46 [1] : vector<1x8xf32> to vector<1xf32>
      %139 = vector.shape_cast %138 : vector<1xf32> to vector<1x1xf32>
      %cst_47 = arith.constant 8.000000e+00 : f32
      %140 = vector.broadcast %cst_47 : f32 to vector<1x1xf32>
      %141 = arith.divf %139, %140 : vector<1x1xf32>
      %142 = arith.addf %132, %141 : vector<1x1xf32>
      %cst_48 = arith.constant 5.000000e-01 : f32
      %143 = vector.broadcast %cst_48 : f32 to vector<1x1xf32>
      %144 = arith.mulf %143, %142 : vector<1x1xf32>
      %145 = arith.subf %92, %35 : vector<1x1xf32>
      %146 = arith.subf %118, %42 : vector<1x1xf32>
      %147 = arith.subf %144, %49 : vector<1x1xf32>
      %148 = arith.addf %145, %146 : vector<1x1xf32>
      %149 = arith.addf %148, %147 : vector<1x1xf32>
      %cst_49 = arith.constant 0.333333343 : f32
      %150 = vector.broadcast %cst_49 : f32 to vector<1x1xf32>
      %151 = arith.mulf %149, %150 : vector<1x1xf32>
      %152 = tpu.concatenate %151, %145, %146, %147 in 1 : vector<1x1xf32>, vector<1x1xf32>, vector<1x1xf32>, vector<1x1xf32> -> vector<1x4xf32>
      %c0_50 = arith.constant 0 : index
      %c0_51 = arith.constant 0 : index
      %153 = vector.load %arg4[%c0_50, %c0_51] : memref<1x4xf32, #tpu.memory_space<vmem>>, vector<1x4xf32>
      tpu.vector_store %arg4[%c0_50, %c0_51], %152 {strides = array<i32>} : memref<1x4xf32, #tpu.memory_space<vmem>>, vector<1x4xf32>,
    } else {
    }
    %cst_23 = arith.constant 4.000000e+01 : f32
    %64 = arith.cmpf oge, %1, %cst_23 : f32
    %65 = arith.extui %64 : i1 to i32
    %c0_i32_24 = arith.constant 0 : i32
    %66 = arith.cmpi ne, %65, %c0_i32_24 : i32
    scf.if %66 {
      %cst_25 = arith.constant dense<0xFF800000> : vector<8xf32>
      %67 = vector.multi_reduction <maximumf>, %52, %cst_25 [0] : vector<8x8xf32> to vector<8xf32>
      %68 = vector.shape_cast %67 : vector<8xf32> to vector<1x8xf32>
      %69 = vector.broadcast %56 : vector<8x1xf32> to vector<8x8xf32>
      %70 = arith.subf %52, %69 : vector<8x8xf32>
      %71 = math.exp %70 : vector<8x8xf32>
      %72 = vector.broadcast %68 : vector<1x8xf32> to vector<8x8xf32>
      %73 = arith.subf %52, %72 : vector<8x8xf32>
      %74 = math.exp %73 : vector<8x8xf32>
      %cst_26 = arith.constant dense<0.000000e+00> : vector<8xf32>
      %75 = vector.multi_reduction <add>, %71, %cst_26 [1] : vector<8x8xf32> to vector<8xf32>
      %76 = vector.shape_cast %75 : vector<8xf32> to vector<8x1xf32>
      %77 = math.log %76 : vector<8x1xf32>
      %78 = arith.addf %56, %77 : vector<8x1xf32>
      %cst_27 = arith.constant dense<0.000000e+00> : vector<1xf32>
      %79 = vector.multi_reduction <add>, %78, %cst_27 [0] : vector<8x1xf32> to vector<1xf32>
      %80 = vector.shape_cast %79 : vector<1xf32> to vector<1x1xf32>
      %cst_28 = arith.constant 8.000000e+00 : f32
      %81 = vector.broadcast %cst_28 : f32 to vector<1x1xf32>
      %82 = arith.divf %80, %81 : vector<1x1xf32>
      %cst_29 = arith.constant dense<0.000000e+00> : vector<8xf32>
      %83 = vector.multi_reduction <add>, %74, %cst_29 [0] : vector<8x8xf32> to vector<8xf32>
      %84 = vector.shape_cast %83 : vector<8xf32> to vector<1x8xf32>
      %85 = math.log %84 : vector<1x8xf32>
      %86 = arith.addf %68, %85 : vector<1x8xf32>
      %cst_30 = arith.constant dense<0.000000e+00> : vector<1xf32>
      %87 = vector.multi_reduction <add>, %86, %cst_30 [1] : vector<1x8xf32> to vector<1xf32>
      %88 = vector.shape_cast %87 : vector<1xf32> to vector<1x1xf32>
      %cst_31 = arith.constant 8.000000e+00 : f32
      %89 = vector.broadcast %cst_31 : f32 to vector<1x1xf32>
      %90 = arith.divf %88, %89 : vector<1x1xf32>
      %91 = arith.addf %82, %90 : vector<1x1xf32>
      %cst_32 = arith.constant 5.000000e-01 : f32
      %92 = vector.broadcast %cst_32 : f32 to vector<1x1xf32>
      %93 = arith.mulf %92, %91 : vector<1x1xf32>
      %cst_33 = arith.constant dense<0xFF800000> : vector<8xf32>
      %94 = vector.multi_reduction <maximumf>, %54, %cst_33 [0] : vector<8x8xf32> to vector<8xf32>
      %95 = vector.shape_cast %94 : vector<8xf32> to vector<1x8xf32>
      %96 = vector.broadcast %58 : vector<8x1xf32> to vector<8x8xf32>
      %97 = arith.subf %54, %96 : vector<8x8xf32>
      %98 = math.exp %97 : vector<8x8xf32>
      %99 = vector.broadcast %95 : vector<1x8xf32> to vector<8x8xf32>
      %100 = arith.subf %54, %99 : vector<8x8xf32>
      %101 = math.exp %100 : vector<8x8xf32>
      %cst_34 = arith.constant dense<0.000000e+00> : vector<8xf32>
      %102 = vector.multi_reduction <add>, %98, %cst_34 [1] : vector<8x8xf32> to vector<8xf32>
      %103 = vector.shape_cast %102 : vector<8xf32> to vector<8x1xf32>
      %104 = math.log %103 : vector<8x1xf32>
      %105 = arith.addf %58, %104 : vector<8x1xf32>
      %cst_35 = arith.constant dense<0.000000e+00> : vector<1xf32>
      %106 = vector.multi_reduction <add>, %105, %cst_35 [0] : vector<8x1xf32> to vector<1xf32>
      %107 = vector.shape_cast %106 : vector<1xf32> to vector<1x1xf32>
      %cst_36 = arith.constant 8.000000e+00 : f32
      %108 = vector.broadcast %cst_36 : f32 to vector<1x1xf32>
      %109 = arith.divf %107, %108 : vector<1x1xf32>
      %cst_37 = arith.constant dense<0.000000e+00> : vector<8xf32>
      %110 = vector.multi_reduction <add>, %101, %cst_37 [0] : vector<8x8xf32> to vector<8xf32>
      %111 = vector.shape_cast %110 : vector<8xf32> to vector<1x8xf32>
      %112 = math.log %111 : vector<1x8xf32>
      %113 = arith.addf %95, %112 : vector<1x8xf32>
      %cst_38 = arith.constant dense<0.000000e+00> : vector<1xf32>
      %114 = vector.multi_reduction <add>, %113, %cst_38 [1] : vector<1x8xf32> to vector<1xf32>
      %115 = vector.shape_cast %114 : vector<1xf32> to vector<1x1xf32>
      %cst_39 = arith.constant 8.000000e+00 : f32
      %116 = vector.broadcast %cst_39 : f32 to vector<1x1xf32>
      %117 = arith.divf %115, %116 : vector<1x1xf32>
      %118 = arith.addf %109, %117 : vector<1x1xf32>
      %cst_40 = arith.constant 5.000000e-01 : f32
      %119 = vector.broadcast %cst_40 : f32 to vector<1x1xf32>
      %120 = arith.mulf %119, %118 : vector<1x1xf32>
      %cst_41 = arith.constant dense<0xFF800000> : vector<8xf32>
      %121 = vector.multi_reduction <maximumf>, %53, %cst_41 [0] : vector<8x8xf32> to vector<8xf32>
      %122 = vector.shape_cast %121 : vector<8xf32> to vector<1x8xf32>
      %123 = vector.broadcast %60 : vector<8x1xf32> to vector<8x8xf32>
      %124 = arith.subf %53, %123 : vector<8x8xf32>
      %125 = math.exp %124 : vector<8x8xf32>
      %126 = vector.broadcast %122 : vector<1x8xf32> to vector<8x8xf32>
      %127 = arith.subf %53, %126 : vector<8x8xf32>
      %128 = math.exp %127 : vector<8x8xf32>
      %cst_42 = arith.constant dense<0.000000e+00> : vector<8xf32>
      %129 = vector.multi_reduction <add>, %125, %cst_42 [1] : vector<8x8xf32> to vector<8xf32>
      %130 = vector.shape_cast %129 : vector<8xf32> to vector<8x1xf32>
      %131 = math.log %130 : vector<8x1xf32>
      %132 = arith.addf %60, %131 : vector<8x1xf32>
      %cst_43 = arith.constant dense<0.000000e+00> : vector<1xf32>
      %133 = vector.multi_reduction <add>, %132, %cst_43 [0] : vector<8x1xf32> to vector<1xf32>
      %134 = vector.shape_cast %133 : vector<1xf32> to vector<1x1xf32>
      %cst_44 = arith.constant 8.000000e+00 : f32
      %135 = vector.broadcast %cst_44 : f32 to vector<1x1xf32>
      %136 = arith.divf %134, %135 : vector<1x1xf32>
      %cst_45 = arith.constant dense<0.000000e+00> : vector<8xf32>
      %137 = vector.multi_reduction <add>, %128, %cst_45 [0] : vector<8x8xf32> to vector<8xf32>
      %138 = vector.shape_cast %137 : vector<8xf32> to vector<1x8xf32>
      %139 = math.log %138 : vector<1x8xf32>
      %140 = arith.addf %122, %139 : vector<1x8xf32>
      %cst_46 = arith.constant dense<0.000000e+00> : vector<1xf32>
      %141 = vector.multi_reduction <add>, %140, %cst_46 [1] : vector<1x8xf32> to vector<1xf32>
      %142 = vector.shape_cast %141 : vector<1xf32> to vector<1x1xf32>
      %cst_47 = arith.constant 8.000000e+00 : f32
      %143 = vector.broadcast %cst_47 : f32 to vector<1x1xf32>
      %144 = arith.divf %142, %143 : vector<1x1xf32>
      %145 = arith.addf %136, %144 : vector<1x1xf32>
      %cst_48 = arith.constant 5.000000e-01 : f32
      %146 = vector.broadcast %cst_48 : f32 to vector<1x1xf32>
      %147 = arith.mulf %146, %145 : vector<1x1xf32>
      %148 = arith.subf %93, %35 : vector<1x1xf32>
      %149 = arith.subf %120, %42 : vector<1x1xf32>
      %150 = arith.subf %147, %49 : vector<1x1xf32>
      %151 = arith.addf %148, %149 : vector<1x1xf32>
      %152 = arith.addf %151, %150 : vector<1x1xf32>
      %cst_49 = arith.constant 0.333333343 : f32
      %153 = vector.broadcast %cst_49 : f32 to vector<1x1xf32>
      %154 = arith.mulf %152, %153 : vector<1x1xf32>
      %155 = tpu.concatenate %154, %148, %149, %150 in 1 : vector<1x1xf32>, vector<1x1xf32>, vector<1x1xf32>, vector<1x1xf32> -> vector<1x4xf32>
      %c0_50 = arith.constant 0 : index
      %c0_51 = arith.constant 0 : index
      %156 = vector.load %arg4[%c0_50, %c0_51] : memref<1x4xf32, #tpu.memory_space<vmem>>, vector<1x4xf32>
      tpu.vector_store %arg4[%c0_50, %c0_51], %155 {strides = array<i32>} : memref<1x4xf32, #tpu.memory_space<vmem>>, vector<1x4xf32>,
    } else {
    }
    return
  }
}

</mosaic_0001>

<bundles_post_ra>
// kernel: tpu_custom_call.1
= control target key start
LH: loop header
LB: loop body
LE: loop exit
PB: predicated region body
PF: predicated region fallthrough
CT: control target
= control target key end

     0   :  { %10 = vsyncpa [#allocation4], 0  ;;  %s888_s0 = inlined_call_operand.<no memory space> [shape: f32[1], index: 0, kind: input, shape index: {}]   ;;  %s889_s1 = inlined_call_operand.hbm [shape: f32[8,32], index: 1, kind: input, shape index: {}]   ;;  %s890_s2 = inlined_call_operand.hbm [shape: f32[8,32], index: 2, kind: input, shape index: {}]   ;;  %s891_s3 = inlined_call_operand.hbm [shape: f32[8,32], index: 3, kind: input, shape index: {}]   ;;  %s892_s4 = inlined_call_operand.hbm [shape: f32[1,4], index: 4, kind: output, shape index: {}]  }
   0x1   :  { %11 = vsyncpa [#allocation7], 0 }
   0x2   :  { %12 = vsyncpa [#allocation5], 0  ;;  %s726_s15 = smov [#allocation6]   ;;  %s727_s17 = smov [#allocation3]  }
   0x3   :  { %s31_s16 = sshll.u32 %s726_s15, 4  ;;  %s21_s18 = sshll.u32 %s727_s17, 4  ;;  %s32_s16 = int_to_ptr.vmem [resolvable:$true] %s31_s16  ;;  %s22_s18 = int_to_ptr.vmem [resolvable:$true] %s21_s18 }
   0x4   :  { %s648_s19 = scalar_lea.vmem %s32_s16, 128  ;;  %p653_p1 = scmp.lt.s32.totalorder %s32_s16, %s32_s16 }
   0x5   :  { %p649_p0 = scmp.ne.s32.totalorder %s32_s16, %s648_s19  ;;  %p654_p2 = scmp.lt.s32.totalorder %s648_s19, %s648_s19 }
   0x7   :  { %p655_p3 = por %p654_p2, %p653_p1 }
   0x9   :  { %p656_p4 = pnand %p655_p3, %p649_p0 }
   0xb   :  { %659 = shalt.err (!%p656_p4)
}
   0xc   :  { %34 = dma.hbm_to_vmem [thread:$0]  %s890_s2, 128, %s32_s16, [#allocation7]  }
   0xd   :  { %s668_s22 = scalar_lea.vmem %s22_s18, 128  ;;  %p673_p6 = scmp.lt.s32.totalorder %s22_s18, %s22_s18 }
   0xe   :  { %p669_p5 = scmp.ne.s32.totalorder %s22_s18, %s668_s22  ;;  %p674_p7 = scmp.lt.s32.totalorder %s668_s22, %s668_s22 }
  0x10   :  { %p675_p8 = por %p674_p7, %p673_p6 }
  0x12   :  { %p676_p9 = pnand %p675_p8, %p669_p5 }
  0x14   :  { %679 = shalt.err (!%p676_p9)
}
  0x15   :  { %24 = dma.hbm_to_vmem [thread:$0]  %s889_s1, 128, %s22_s18, [#allocation4]  }
  0x16   :  { %s728_s25 = smov [#allocation8]  }
  0x17   :  { %s41_s26 = sshll.u32 %s728_s25, 4  ;;  %s42_s26 = int_to_ptr.vmem [resolvable:$true] %s41_s26 }
  0x18   :  { %s688_s27 = scalar_lea.vmem %s42_s26, 128  ;;  %p693_p11 = scmp.lt.s32.totalorder %s42_s26, %s42_s26 }
  0x19   :  { %p689_p10 = scmp.ne.s32.totalorder %s42_s26, %s688_s27  ;;  %p694_p12 = scmp.lt.s32.totalorder %s688_s27, %s688_s27 }
  0x1b   :  { %p695_p13 = por %p694_p12, %p693_p11 }
  0x1d   :  { %p696_p0 = pnand %p695_p13, %p689_p10 }
  0x1f   :  { %699 = shalt.err (!%p696_p0)
}
  0x20   :  { %44 = dma.hbm_to_vmem [thread:$0]  %s891_s3, 128, %s42_s26, [#allocation7]  }
  0x21   :  { %720 = dma.done.wait [#allocation4], 128  }
  0x22   :  { %721 = vsyncadd [#allocation4], 4294967168 }
  0x23   :  { %722 = dma.done.wait [#allocation7], 256  }
  0x24   :  { %723 = vsyncadd [#allocation7], 4294967040  ;;  %vm58_vm0 = vcmask 261120   ;;  %v74_v0 = vld [vmem:[#allocation8] sm:$0xff]  ;;  %v66_v1 = vld [vmem:[#allocation6] sm:$0xff]  ;;  %v729_v9 = vmov 0.0   ;;  %v63_v13 = vstv %s888_s0  ;;  %s812_s5 = smul.f32 %s888_s0, %s888_s0 }
  0x25   :  { %v56_v2 = vld [vmem:[#allocation3] sm:$0xff]  ;;  %v75_v3 = vmul.f32 %v74_v0, %v74_v0  ;;  %v67_v4 = vmul.f32 %v66_v1, %v66_v1  ;;  %581 = vmatprep.subr.mxu1 %v729_v9  ;;  %vm730_vm1 = vmmov 0   ;;  %vm270_vm2 = vcmask 64512  }
  0x26   :  { %v57_v5 = vmul.f32 %v56_v2, %v56_v2  ;;  %583 = vmatprep.mubr.msk.f32.mxu1 %vm730_vm1, %v729_v9  ;;  %p280_p1 = scmp.lt.f32.partialorder %s812_s5, 40.0 }
  0x27   :  { %v76_v6 = vsel %vm58_vm0, %v75_v3, 0.0  ;;  %v68_v7 = vsel %vm58_vm0, %v67_v4, 0.0  ;;  %vm401_vm3 = vcmask (%p280_p1), 7168   ;;  %vm403_vm4 = vcmask (%p280_p1), 15360  }
  0x28   :  { %77 = vadd.xlane.f32.xlu1 %v76_v6  ;;  %69 = vadd.xlane.f32.xlu0 %v68_v7  ;;  %v59_v8 = vsel %vm58_vm0, %v57_v5, 0.0  ;;  %vm405_vm5 = vcmask (%p280_p1), 23552   ;;  %vm407_vm6 = vcmask (%p280_p1), 24576  }
  0x2c   :  { %60 = vadd.xlane.f32.xlu0 %v59_v8 }
  0xb1   :  { %v78_v10 = vpop.xlane.xlu1 %77  ;;  %v70_v11 = vpop.xlane.xlu0 %69 }
  0xb2   :  { %592 = vrsqrt.f32 %v78_v10 }
  0xb3   :  { %594 = vrsqrt.f32 %v70_v11 }
  0xb5   :  { %v61_v12 = vpop.xlane.xlu0 %60 }
  0xb6   :  { %596 = vrsqrt.f32 %v61_v12 }
  0xbf   :  { %v593_v14 = vpop.eup %592 }
  0xc0   :  { %v595_v15 = vpop.eup %594  ;;  %v80_v16 = vmul.f32 %v593_v14, %v63_v13 }
  0xc1   :  { %v72_v17 = vmul.f32 %v595_v15, %v63_v13 }
  0xc2   :  { %v81_v18 = vmul.f32 %v80_v16, %v74_v0 }
  0xc3   :  { %v597_v19 = vpop.eup %596  ;;  %v73_v20 = vmul.f32 %v72_v17, %v66_v1 }
  0xc4   :  { %582 = vmatpush3.xpose.msk.msra.mxu1 %vm58_vm0, %v81_v18  ;;  %v64_v21 = vmul.f32 %v597_v19, %v63_v13 }
  0xc5   :  { %576 = vmatprep.subr.msk.mxu0 %vm58_vm0, %v73_v20  ;;  %v105_v27 = vmul.f32 %v81_v18, %v73_v20 }
  0xc6   :  { %577 = vmatpush3.xpose.msk.msra.mxu0 %vm58_vm0, %v73_v20  ;;  %v65_v22 = vmul.f32 %v64_v21, %v56_v2 }
  0xc7   :  { %v106_v28 = vsel %vm58_vm0, %v105_v27, 0.0 }
  0xc8   :  { %578 = vmatprep.mubr.msk.f32.mxu0 %vm58_vm0, %v65_v22  ;;  %584 = vmatmul.mubr.msk.f32.vlgmr.msra.gmra.mxu1 %vm58_vm0, %v65_v22  ;;  %v94_v23 = vmul.f32 %v81_v18, %v65_v22  ;;  %v82_v24 = vmul.f32 %v73_v20, %v65_v22 }
  0xc9   :  { %579 = vmatmul.mubr.msk.f32.vlgmr.msra.gmra.mxu0 %vm58_vm0, %v81_v18 }
  0xca   :  { %v95_v25 = vsel %vm58_vm0, %v94_v23, 0.0  ;;  %v83_v26 = vsel %vm58_vm0, %v82_v24, 0.0 }
  0xcb   :  { %96 = vadd.xlane.f32.xlu0 %v95_v25  ;;  %84 = vadd.xlane.f32.xlu1 %v83_v26 }
  0xcf   :  { %107 = vadd.xlane.f32.xlu1 %v106_v28 }
 0x154   :  { %v97_v29 = vpop.xlane.xlu0 %96  ;;  %v85_v30 = vpop.xlane.xlu1 %84 }
 0x155   :  { %v98_v31 = vrot.slane %v97_v29, 4  ;;  %v86_v32 = vrot.slane %v85_v30, 4 }
 0x157   :  { %v99_v33 = vadd.f32 %v98_v31, %v97_v29  ;;  %v87_v34 = vadd.f32 %v86_v32, %v85_v30 }
 0x158   :  { %v108_v35 = vpop.xlane.xlu1 %107 }
 0x159   :  { %v100_v36 = vrot.slane %v99_v33, 2  ;;  %v88_v37 = vrot.slane %v87_v34, 2  ;;  %v109_v38 = vrot.slane %v108_v35, 4 }
 0x15b   :  { %v101_v39 = vadd.f32 %v100_v36, %v99_v33  ;;  %v89_v40 = vadd.f32 %v88_v37, %v87_v34  ;;  %v110_v41 = vadd.f32 %v109_v38, %v108_v35 }
 0x15d   :  { %v102_v42 = vrot.slane %v101_v39, 1  ;;  %v90_v43 = vrot.slane %v89_v40, 1  ;;  %v111_v44 = vrot.slane %v110_v41, 2 }
 0x15f   :  { %v103_v45 = vadd.f32 %v102_v42, %v101_v39  ;;  %v91_v46 = vadd.f32 %v90_v43, %v89_v40  ;;  %v112_v47 = vadd.f32 %v111_v44, %v110_v41 }
 0x161   :  { %v781_v48 = vmul.f32 0.125, %v103_v45  ;;  %v783_v49 = vmul.f32 0.125, %v91_v46  ;;  %v113_v50 = vrot.slane %v112_v47, 1 }
 0x163   :  { %v114_v51 = vadd.f32 %v113_v50, %v112_v47 }
 0x165   :  { %v785_v52 = vmul.f32 0.125, %v114_v51 }
 0x188   :  { %v787_v53 = vpop.f32.mrf.mxu1 }
 0x189   :  { %v789_v54 = vpop.f32.mrf.mxu0  ;;  %v793_v55 = vsel %vm270_vm2, %v787_v53, -inf }
 0x18a   :  { %v585_v56 = vpop.f32.mrf.mxu1  ;;  %275 = vmax.xlane.f32.xlu1 %v793_v55  ;;  %v805_v59 = vsel %vm270_vm2, %v789_v54, -inf }
 0x18b   :  { %v796_v57 = vpop.f32.mrf.mxu0 }
 0x18c   :  { %v800_v58 = vsel %vm270_vm2, %v796_v57, -inf }
 0x18d   :  { %272 = vmax.xlane.f32.xlu0 %v800_v58 }
 0x191   :  { %278 = vmax.xlane.f32.xlu0 %v805_v59 }
 0x213   :  { %v815_v60 = vpop.xlane.xlu1 %275 }
 0x214   :  { %v321_v1 = vrot.slane (%p280_p1), %v815_v60, 4 }
 0x216   :  { %v817_v61 = vpop.xlane.xlu0 %272  ;;  %283 = sbr.rel (!%p280_p1) target bundleno = 761 (0x2f9), region = 33  ;;  %v322_v4 = vmax.f32 (%p280_p1), %v815_v60, %v321_v1 }
 0x217   :  { %v284_v0 = vrot.slane (%p280_p1), %v817_v61, 4 }
 0x218   :  { %v323_v7 = vrot.slane (%p280_p1), %v322_v4, 2 }
 0x219   :  { %v285_v3 = vmax.f32 (%p280_p1), %v817_v61, %v284_v0 }
 0x21a   :  { %v819_v62 = vpop.xlane.xlu0 %278  ;;  %v324_v10 = vmax.f32 (%p280_p1), %v322_v4, %v323_v7 }
 0x21b   :  { %v358_v63 = vrot.slane %v819_v62, 4  ;;  %v286_v6 = vrot.slane %v285_v3, 2 }
 0x21c   :  { %v325_v13 = vrot.slane %v324_v10, 1 }
 0x21d   :  { %v359_v2 = vmax.f32 %v819_v62, %v358_v63  ;;  %v287_v9 = vmax.f32 %v285_v3, %v286_v6 }
 0x21e   :  { %v831_v16 = vmax.f32 %v324_v10, %v325_v13 }
 0x21f   :  { %v360_v5 = vrot.slane %v359_v2, 2  ;;  %v288_v12 = vrot.slane %v287_v9, 1 }
 0x220   :  { %v327_v19 = vsub.f32 %v787_v53, %v831_v16 }
 0x221   :  { %v361_v8 = vmax.f32 %v359_v2, %v360_v5  ;;  %v829_v15 = vmax.f32 %v287_v9, %v288_v12 }
 0x222   :  { %v328_v22 = vmul.f32 1.442695, %v327_v19 }
 0x223   :  { %v362_v11 = vrot.slane %v361_v8, 1  ;;  %v290_v18 = vsub.f32 %v796_v57, %v829_v15 }
 0x225   :  { %v827_v14 = vmax.f32 %v361_v8, %v362_v11  ;;  %v291_v21 = vmul.f32 1.442695, %v290_v18 }
 0x227   :  { %v364_v17 = vsub.f32 %v789_v54, %v827_v14 }
 0x229   :  { %v365_v20 = vmul.f32 1.442695, %v364_v17 }
 0x22b   :  { %598 = vpow2.f32 %v365_v20 }
 0x22c   :  { %600 = vpow2.f32 %v291_v21 }
 0x22d   :  { %602 = vpow2.f32 %v328_v22 }
 0x238   :  { %v599_v23 = vpop.eup %598 }
 0x239   :  { %v601_v24 = vpop.eup %600  ;;  %v367_v25 = vsel %vm270_vm2, %v599_v23, 0.0 }
 0x23a   :  { %v603_v26 = vpop.eup %602  ;;  %368 = vadd.xlane.f32.xlu1 %v367_v25  ;;  %v380_v27 = vrot.slane %v367_v25, 4  ;;  %v293_v28 = vsel %vm270_vm2, %v601_v24, 0.0 }
 0x23b   :  { %294 = vadd.xlane.f32.xlu0 %v293_v28  ;;  %v306_v29 = vrot.slane %v293_v28, 4  ;;  %v330_v30 = vsel %vm270_vm2, %v603_v26, 0.0 }
 0x23c   :  { %v381_v31 = vadd.f32 %v380_v27, %v367_v25  ;;  %v343_v32 = vrot.slane %v330_v30, 4 }
 0x23d   :  { %v307_v33 = vadd.f32 %v306_v29, %v293_v28 }
 0x23e   :  { %v382_v34 = vrot.slane %v381_v31, 2  ;;  %v344_v35 = vadd.f32 %v343_v32, %v330_v30 }
 0x23f   :  { %v308_v36 = vrot.slane %v307_v33, 2  ;;  %331 = vadd.xlane.f32.xlu0 %v330_v30 }
 0x240   :  { %v383_v37 = vadd.f32 %v382_v34, %v381_v31  ;;  %v345_v38 = vrot.slane %v344_v35, 2 }
 0x241   :  { %v309_v39 = vadd.f32 %v308_v36, %v307_v33 }
 0x242   :  { %v384_v40 = vrot.slane %v383_v37, 1  ;;  %v346_v41 = vadd.f32 %v345_v38, %v344_v35 }
 0x243   :  { %v310_v42 = vrot.slane %v309_v39, 1 }
 0x244   :  { %v347_v43 = vrot.slane %v346_v41, 1  ;;  %v385_v44 = vadd.f32 %v384_v40, %v383_v37 }
 0x245   :  { %v311_v45 = vadd.f32 %v310_v42, %v309_v39 }
 0x246   :  { %v348_v46 = vadd.f32 %v347_v43, %v346_v41  ;;  %604 = vlog2.f32 %v385_v44 }
 0x247   :  { %606 = vlog2.f32 %v311_v45 }
 0x248   :  { %608 = vlog2.f32 %v348_v46 }
 0x253   :  { %v605_v47 = vpop.eup %604 }
 0x254   :  { %v607_v50 = vpop.eup %606  ;;  %v387_v51 = vmul.f32 0.6931472, %v605_v47 }
 0x255   :  { %v609_v56 = vpop.eup %608  ;;  %v313_v63 = vmul.f32 0.6931472, %v607_v50 }
 0x256   :  { %v350_v0 = vmul.f32 0.6931472, %v609_v56  ;;  %v388_v2 = vadd.f32 %v387_v51, %v827_v14 }
 0x257   :  { %v314_v1 = vadd.f32 %v313_v63, %v829_v15 }
 0x258   :  { %v351_v3 = vadd.f32 %v350_v0, %v831_v16  ;;  %v389_v6 = vsel %vm270_vm2, %v388_v2, 0.0 }
 0x259   :  { %v315_v4 = vsel %vm270_vm2, %v314_v1, 0.0 }
 0x25a   :  { %316 = vadd.xlane.f32.xlu1 %v315_v4  ;;  %v352_v5 = vsel %vm270_vm2, %v351_v3, 0.0 }
 0x25b   :  { %353 = vadd.xlane.f32.xlu0 %v352_v5 }
 0x25e   :  { %390 = vadd.xlane.f32.xlu1 %v389_v6 }
 0x2c3   :  { %v369_v7 = vpop.xlane.xlu1 %368 }
 0x2c4   :  { %610 = vlog2.f32 %v369_v7  ;;  %v295_v8 = vpop.xlane.xlu0 %294 }
 0x2c5   :  { %612 = vlog2.f32 %v295_v8 }
 0x2c8   :  { %v332_v9 = vpop.xlane.xlu0 %331 }
 0x2c9   :  { %614 = vlog2.f32 %v332_v9 }
 0x2d1   :  { %v611_v10 = vpop.eup %610 }
 0x2d2   :  { %v613_v11 = vpop.eup %612  ;;  %v371_v12 = vmul.f32 0.6931472, %v611_v10 }
 0x2d3   :  { %v297_v13 = vmul.f32 0.6931472, %v613_v11 }
 0x2d4   :  { %v372_v17 = vadd.f32 %v371_v12, %v827_v14 }
 0x2d5   :  { %v298_v18 = vadd.f32 %v297_v13, %v829_v15 }
 0x2d6   :  { %v615_v19 = vpop.eup %614  ;;  %v373_v20 = vrot.slane %v372_v17, 4 }
 0x2d7   :  { %v299_v21 = vrot.slane %v298_v18, 4  ;;  %v334_v22 = vmul.f32 0.6931472, %v615_v19 }
 0x2d8   :  { %v374_v23 = vadd.f32 %v373_v20, %v372_v17 }
 0x2d9   :  { %v300_v24 = vadd.f32 %v299_v21, %v298_v18  ;;  %v335_v25 = vadd.f32 %v334_v22, %v831_v16 }
 0x2da   :  { %v375_v26 = vrot.slane %v374_v23, 2 }
 0x2db   :  { %v336_v27 = vrot.slane %v335_v25, 4  ;;  %v301_v28 = vrot.slane %v300_v24, 2 }
 0x2dc   :  { %v376_v29 = vadd.f32 %v375_v26, %v374_v23 }
 0x2dd   :  { %v337_v30 = vadd.f32 %v336_v27, %v335_v25  ;;  %v302_v31 = vadd.f32 %v301_v28, %v300_v24 }
 0x2de   :  { %v377_v34 = vrot.slane %v376_v29, 1 }
 0x2df   :  { %v303_v32 = vrot.slane %v302_v31, 1  ;;  %v338_v33 = vrot.slane %v337_v30, 2 }
 0x2e0   :  { %v378_v40 = vadd.f32 %v377_v34, %v376_v29 }
 0x2e1   :  { %v304_v14 = vadd.f32 %v303_v32, %v302_v31  ;;  %v339_v35 = vadd.f32 %v338_v33, %v337_v30 }
 0x2e2   :  { %v379_v45 = vmul.f32 0.125, %v378_v40 }
 0x2e3   :  { %v305_v15 = vmul.f32 0.125, %v304_v14  ;;  %v317_v36 = vpop.xlane.xlu1 %316  ;;  %v340_v37 = vrot.slane %v339_v35, 1 }
 0x2e4   :  { %v318_v38 = vmul.f32 0.125, %v317_v36  ;;  %v354_v39 = vpop.xlane.xlu0 %353 }
 0x2e5   :  { %v341_v41 = vadd.f32 %v340_v37, %v339_v35  ;;  %v355_v42 = vmul.f32 0.125, %v354_v39 }
 0x2e6   :  { %v319_v16 = vadd.f32 %v318_v38, %v305_v15 }
 0x2e7   :  { %v342_v43 = vmul.f32 0.125, %v341_v41  ;;  %v391_v44 = vpop.xlane.xlu1 %390 }
 0x2e8   :  { %v392_v46 = vmul.f32 0.125, %v391_v44  ;;  %v320_v47 = vmul.f32 0.5, %v319_v16 }
 0x2e9   :  { %v356_v50 = vadd.f32 %v355_v42, %v342_v43 }
 0x2ea   :  { %v393_v51 = vadd.f32 %v392_v46, %v379_v45  ;;  %v395_v0 = vsub.f32 %v320_v47, %v783_v49 }
 0x2eb   :  { %v357_v56 = vmul.f32 0.5, %v356_v50 }
 0x2ec   :  { %v394_v63 = vmul.f32 0.5, %v393_v51 }
 0x2ed   :  { %v396_v1 = vsub.f32 %v357_v56, %v781_v48 }
 0x2ee   :  { %v397_v2 = vsub.f32 %v394_v63, %v785_v52 }
 0x2ef   :  { %v398_v3 = vadd.f32 %v396_v1, %v395_v0 }
 0x2f1   :  { %v399_v4 = vadd.f32 %v398_v3, %v397_v2 }
 0x2f3   :  { %v400_v5 = vmul.f32 0.33333334, %v399_v4 }
 0x2f5   :  { %v402_v6 = vsel %vm401_vm3, %v400_v5, %v395_v0 }
 0x2f6   :  { %v404_v7 = vsel %vm403_vm4, %v402_v6, %v396_v1 }
 0x2f7   :  { %v406_v8 = vsel %vm405_vm5, %v404_v7, %v397_v2 }
 0x2f8   :  { %408 = vst.msk [vmem:[#allocation9] sm:$0x1] %vm407_vm6, %v406_v8 }
 0x2f9 PF:  { %p409_p2 = scmp.ge.f32.partialorder %s812_s5, 40.0 }
 0x2fa   :  { %v419_v9 = vsub.f32 (%p409_p2), %v796_v57, %v817_v61  ;;  %v460_v10 = vsub.f32 (%p409_p2), %v787_v53, %v815_v60  ;;  %v501_v11 = vsub.f32 (%p409_p2), %v789_v54, %v819_v62  ;;  %v454_v12 = vrot.slane (%p409_p2), %v793_v55, 4 }
 0x2fb   :  { %412 = sbr.rel (!%p409_p2) target bundleno = 983 (0x3d7), region = 37  ;;  %v413_v13 = vrot.slane (%p409_p2), %v800_v58, 4  ;;  %v495_v17 = vrot.slane (%p409_p2), %v805_v59, 4  ;;  %vm542_vm7 = vcmask (%p409_p2), 7168   ;;  %vm544_vm8 = vcmask (%p409_p2), 15360  }
 0x2fc   :  { %v420_v18 = vmul.f32 (%p409_p2), 1.442695, %v419_v9  ;;  %v461_v19 = vmul.f32 (%p409_p2), 1.442695, %v460_v10  ;;  %v502_v20 = vmul.f32 (%p409_p2), 1.442695, %v501_v11  ;;  %v455_v21 = vmax.f32 (%p409_p2), %v793_v55, %v454_v12 }
 0x2fd   :  { %v414_v22 = vmax.f32 (%p409_p2), %v800_v58, %v413_v13  ;;  %v496_v23 = vmax.f32 (%p409_p2), %v805_v59, %v495_v17  ;;  %vm546_vm9 = vcmask (%p409_p2), 23552   ;;  %vm548_vm10 = vcmask (%p409_p2), 24576  }
 0x2fe   :  { %616 = vpow2.f32 (%p409_p2), %v420_v18  ;;  %v456_v24 = vrot.slane (%p409_p2), %v455_v21, 2 }
 0x2ff   :  { %618 = vpow2.f32 (%p409_p2), %v461_v19  ;;  %v415_v25 = vrot.slane (%p409_p2), %v414_v22, 2  ;;  %v497_v26 = vrot.slane (%p409_p2), %v496_v23, 2 }
 0x300   :  { %620 = vpow2.f32 %v502_v20  ;;  %v457_v27 = vmax.f32 %v455_v21, %v456_v24 }
 0x301   :  { %v416_v28 = vmax.f32 %v414_v22, %v415_v25  ;;  %v498_v29 = vmax.f32 %v496_v23, %v497_v26 }
 0x302   :  { %v458_v30 = vrot.slane %v457_v27, 1 }
 0x303   :  { %v417_v31 = vrot.slane %v416_v28, 1  ;;  %v499_v32 = vrot.slane %v498_v29, 1 }
 0x304   :  { %v459_v33 = vmax.f32 %v457_v27, %v458_v30 }
 0x305   :  { %v418_v34 = vmax.f32 %v416_v28, %v417_v31  ;;  %v500_v14 = vmax.f32 %v498_v29, %v499_v32 }
 0x306   :  { %v463_v55 = vsub.f32 %v787_v53, %v459_v33 }
 0x307   :  { %v422_v58 = vsub.f32 %v796_v57, %v418_v34  ;;  %v504_v59 = vsub.f32 %v789_v54, %v500_v14 }
 0x308   :  { %v464_v35 = vmul.f32 1.442695, %v463_v55 }
 0x309   :  { %v423_v15 = vmul.f32 1.442695, %v422_v58  ;;  %v505_v36 = vmul.f32 1.442695, %v504_v59 }
 0x30a   :  { %622 = vpow2.f32 %v464_v35 }
 0x30b   :  { %v617_v37 = vpop.eup %616  ;;  %624 = vpow2.f32 %v423_v15 }
 0x30c   :  { %v619_v38 = vpop.eup %618  ;;  %v425_v39 = vsel %vm270_vm2, %v617_v37, 0.0  ;;  %626 = vpow2.f32 %v505_v36 }
 0x30d   :  { %v621_v40 = vpop.eup %620  ;;  %426 = vadd.xlane.f32.xlu0 %v425_v39  ;;  %v466_v41 = vsel %vm270_vm2, %v619_v38, 0.0 }
 0x30e   :  { %v507_v53 = vsel %vm270_vm2, %v621_v40, 0.0 }
 0x30f   :  { %508 = vadd.xlane.f32.xlu1 %v507_v53 }
 0x311   :  { %467 = vadd.xlane.f32.xlu0 %v466_v41 }
 0x317   :  { %v623_v57 = vpop.eup %622 }
 0x318   :  { %v625_v54 = vpop.eup %624  ;;  %v479_v42 = vsel %vm270_vm2, %v623_v57, 0.0 }
 0x319   :  { %v627_v16 = vpop.eup %626  ;;  %v480_v43 = vrot.slane %v479_v42, 4  ;;  %v438_v44 = vsel %vm270_vm2, %v625_v54, 0.0 }
 0x31a   :  { %v439_v45 = vrot.slane %v438_v44, 4  ;;  %v520_v46 = vsel %vm270_vm2, %v627_v16, 0.0 }
 0x31b   :  { %v481_v47 = vadd.f32 %v480_v43, %v479_v42  ;;  %v521_v50 = vrot.slane %v520_v46, 4 }
 0x31c   :  { %v440_v51 = vadd.f32 %v439_v45, %v438_v44 }
 0x31d   :  { %v482_v56 = vrot.slane %v481_v47, 2  ;;  %v522_v63 = vadd.f32 %v521_v50, %v520_v46 }
 0x31e   :  { %v441_v0 = vrot.slane %v440_v51, 2 }
 0x31f   :  { %v483_v1 = vadd.f32 %v482_v56, %v481_v47  ;;  %v523_v2 = vrot.slane %v522_v63, 2 }
 0x320   :  { %v442_v3 = vadd.f32 %v441_v0, %v440_v51 }
 0x321   :  { %v484_v4 = vrot.slane %v483_v1, 1  ;;  %v524_v5 = vadd.f32 %v523_v2, %v522_v63 }
 0x322   :  { %v443_v6 = vrot.slane %v442_v3, 1 }
 0x323   :  { %v485_v7 = vadd.f32 %v484_v4, %v483_v1  ;;  %v525_v8 = vrot.slane %v524_v5, 1 }
 0x324   :  { %v444_v9 = vadd.f32 %v443_v6, %v442_v3 }
 0x325   :  { %628 = vlog2.f32 %v485_v7  ;;  %v526_v10 = vadd.f32 %v525_v8, %v524_v5 }
 0x326   :  { %630 = vlog2.f32 %v444_v9 }
 0x327   :  { %632 = vlog2.f32 %v526_v10 }
 0x332   :  { %v629_v11 = vpop.eup %628 }
 0x333   :  { %v631_v12 = vpop.eup %630  ;;  %v487_v13 = vmul.f32 0.6931472, %v629_v11 }
 0x334   :  { %v633_v17 = vpop.eup %632  ;;  %v446_v18 = vmul.f32 0.6931472, %v631_v12 }
 0x335   :  { %v488_v19 = vadd.f32 %v487_v13, %v459_v33  ;;  %v528_v20 = vmul.f32 0.6931472, %v633_v17 }
 0x336   :  { %v447_v21 = vadd.f32 %v446_v18, %v418_v34 }
 0x337   :  { %v489_v22 = vsel %vm270_vm2, %v488_v19, 0.0  ;;  %v529_v23 = vadd.f32 %v528_v20, %v500_v14 }
 0x338   :  { %490 = vadd.xlane.f32.xlu0 %v489_v22  ;;  %v448_v24 = vsel %vm270_vm2, %v447_v21, 0.0 }
 0x339   :  { %449 = vadd.xlane.f32.xlu1 %v448_v24  ;;  %v530_v25 = vsel %vm270_vm2, %v529_v23, 0.0 }
 0x33d   :  { %531 = vadd.xlane.f32.xlu1 %v530_v25 }
 0x396   :  { %v427_v26 = vpop.xlane.xlu0 %426 }
 0x397   :  { %634 = vlog2.f32 %v427_v26 }
 0x398   :  { %v509_v27 = vpop.xlane.xlu1 %508 }
 0x399   :  { %636 = vlog2.f32 %v509_v27 }
 0x39a   :  { %v468_v28 = vpop.xlane.xlu0 %467 }
 0x39b   :  { %638 = vlog2.f32 %v468_v28 }
 0x3a4   :  { %v635_v29 = vpop.eup %634 }
 0x3a5   :  { %v429_v30 = vmul.f32 0.6931472, %v635_v29 }
 0x3a6   :  { %v637_v31 = vpop.eup %636 }
 0x3a7   :  { %v430_v32 = vadd.f32 %v429_v30, %v817_v61  ;;  %v511_v33 = vmul.f32 0.6931472, %v637_v31 }
 0x3a8   :  { %v639_v34 = vpop.eup %638 }
 0x3a9   :  { %v470_v14 = vmul.f32 0.6931472, %v639_v34  ;;  %v431_v55 = vrot.slane %v430_v32, 4  ;;  %v512_v59 = vadd.f32 %v511_v33, %v819_v62 }
 0x3ab   :  { %v471_v58 = vadd.f32 %v470_v14, %v815_v60  ;;  %v432_v15 = vadd.f32 %v431_v55, %v430_v32  ;;  %v513_v37 = vrot.slane %v512_v59, 4 }
 0x3ad   :  { %v472_v35 = vrot.slane %v471_v58, 4  ;;  %v433_v39 = vrot.slane %v432_v15, 2  ;;  %v514_v40 = vadd.f32 %v513_v37, %v512_v59 }
 0x3af   :  { %v473_v36 = vadd.f32 %v472_v35, %v471_v58  ;;  %v434_v53 = vadd.f32 %v433_v39, %v432_v15  ;;  %v515_v57 = vrot.slane %v514_v40, 2 }
 0x3b1   :  { %v474_v38 = vrot.slane %v473_v36, 2  ;;  %v435_v61 = vrot.slane %v434_v53, 1  ;;  %v516_v42 = vadd.f32 %v515_v57, %v514_v40 }
 0x3b3   :  { %v475_v41 = vadd.f32 %v474_v38, %v473_v36  ;;  %v436_v43 = vadd.f32 %v435_v61, %v434_v53  ;;  %v517_v44 = vrot.slane %v516_v42, 1 }
 0x3b5   :  { %v476_v54 = vrot.slane %v475_v41, 1  ;;  %v437_v47 = vmul.f32 0.125, %v436_v43  ;;  %v518_v51 = vadd.f32 %v517_v44, %v516_v42 }
 0x3b7   :  { %v477_v16 = vadd.f32 %v476_v54, %v475_v41  ;;  %v519_v3 = vmul.f32 0.125, %v518_v51 }
 0x3b9   :  { %v478_v60 = vmul.f32 0.125, %v477_v16 }
 0x3c1   :  { %v491_v45 = vpop.xlane.xlu0 %490 }
 0x3c2   :  { %v492_v46 = vmul.f32 0.125, %v491_v45  ;;  %v450_v62 = vpop.xlane.xlu1 %449 }
 0x3c3   :  { %v451_v50 = vmul.f32 0.125, %v450_v62 }
 0x3c4   :  { %v493_v56 = vadd.f32 %v492_v46, %v478_v60 }
 0x3c5   :  { %v452_v63 = vadd.f32 %v451_v50, %v437_v47 }
 0x3c6   :  { %v494_v0 = vmul.f32 0.5, %v493_v56  ;;  %v532_v1 = vpop.xlane.xlu1 %531 }
 0x3c7   :  { %v453_v2 = vmul.f32 0.5, %v452_v63  ;;  %v533_v4 = vmul.f32 0.125, %v532_v1 }
 0x3c8   :  { %v537_v5 = vsub.f32 %v494_v0, %v781_v48 }
 0x3c9   :  { %v536_v6 = vsub.f32 %v453_v2, %v783_v49  ;;  %v534_v7 = vadd.f32 %v533_v4, %v519_v3 }
 0x3cb   :  { %v535_v8 = vmul.f32 0.5, %v534_v7  ;;  %v539_v9 = vadd.f32 %v537_v5, %v536_v6 }
 0x3cd   :  { %v538_v10 = vsub.f32 %v535_v8, %v785_v52 }
 0x3cf   :  { %v540_v11 = vadd.f32 %v539_v9, %v538_v10 }
 0x3d1   :  { %v541_v12 = vmul.f32 0.33333334, %v540_v11 }
 0x3d3   :  { %v543_v13 = vsel %vm542_vm7, %v541_v12, %v536_v6 }
 0x3d4   :  { %v545_v17 = vsel %vm544_vm8, %v543_v13, %v537_v5 }
 0x3d5   :  { %v547_v18 = vsel %vm546_vm9, %v545_v17, %v538_v10 }
 0x3d6   :  { %549 = vst.msk [vmem:[#allocation9] sm:$0x1] %vm548_vm10, %v547_v18 }
 0x3d7 PF:  { %s731_s0 = smov [#allocation9]  }
 0x3d8   :  { %s556_s6 = sshll.u32 %s731_s0, 4  ;;  %s557_s6 = int_to_ptr.vmem [resolvable:$true] %s556_s6 }
 0x3d9   :  { %s700_s7 = scalar_lea.vmem %s557_s6, 16  ;;  %s704_s8 = scalar_lea.vmem %s557_s6, 32 }
 0x3da   :  { %p701_p3 = scmp.ne.s32.totalorder %s557_s6, %s700_s7  ;;  %p705_p4 = scmp.lt.s32.totalorder %s557_s6, %s557_s6 }
 0x3db   :  { %p706_p5 = scmp.lt.s32.totalorder %s704_s8, %s700_s7 }
 0x3dd   :  { %p707_p6 = por %p706_p5, %p705_p4 }
 0x3df   :  { %p708_p7 = pnand %p707_p6, %p701_p3 }
 0x3e1   :  { %711 = shalt.err (!%p708_p7)
}
 0x3e2   :  { %559 = dma.vmem_to_hbm [thread:$0]  %s557_s6, 16, %s892_s4, [#allocation5]  }
 0x3e3   :  { %724 = dma.done.wait [#allocation5], 16  }
 0x3e4   :  { %725 = vsyncadd [#allocation5], 4294967280 }
 0x3e5   :  { %563 = vsyncpa [#allocation4], 1 }
 0x3e6   :  { %564 = vsyncpa [#allocation7], 1 }
 0x3e7   :  { %565 = vsyncpa [#allocation5], 1 }

</bundles_post_ra>
